<compile_context>
chip_gen: v7x
topology: tpu7x:2x2x1
jax: 0.10.0
libtpu: 0.0.40
codegen_flags: <defaults>
</compile_context>

<pallas_src>
import jax
import jax.numpy as jnp
from jax import lax
from jax.experimental import pallas as pl
from jax.experimental.pallas import tpu as pltpu

BN_EPS = 1e-5
C_PAD = 128  # lane-dense classifier output width (true output is sliced out)


def _bn_relu(h, gamma, beta):
    """One-pass training-mode BatchNorm1d folded into scale/shift, fused ReLU."""
    inv_b = 1.0 / h.shape[0]                       # static
    mean = jnp.sum(h, axis=0, keepdims=True) * inv_b
    msq = jnp.sum(h * h, axis=0, keepdims=True) * inv_b
    scale = gamma * lax.rsqrt(msq - mean * mean + BN_EPS)   # EUP rsqrt
    shift = beta - mean * scale
    return jnp.maximum(h * scale + shift, 0.0)


def simplenet_kernel(x_ref, w1_ref, p1_ref, w2_ref, p2_ref, wc_ref, bc_ref,
                     feat_ref, out_ref):
    x = x_ref[...]                                             # (B, D_in) f32
    p1 = p1_ref[...]                                           # (3, H) f32
    p2 = p2_ref[...]                                           # (3, H) f32

    # ---- block 1: Linear -> BN -> ReLU  (bf16 MXU, f32 accumulate) ----
    h = jnp.dot(x.astype(jnp.bfloat16), w1_ref[...],
                preferred_element_type=jnp.float32) + p1[0:1, :]
    h = _bn_relu(h, p1[1:2, :], p1[2:3, :])

    # ---- block 2: Linear -> BN -> ReLU ----
    h = jnp.dot(h.astype(jnp.bfloat16), w2_ref[...],
                preferred_element_type=jnp.float32) + p2[0:1, :]
    h = _bn_relu(h, p2[1:2, :], p2[2:3, :])

    feat_ref[...] = h                                          # (B, H) lane-dense

    # ---- classifier (lane-dense padded output) ----
    out_ref[...] = (jnp.dot(h.astype(jnp.bfloat16), wc_ref[...],
                            preferred_element_type=jnp.float32)
                    + bc_ref[...])                             # (B, C_PAD)


def pack_params(params):
    """One-time packing: bf16 weights, fused small vectors, padded classifier."""
    H = params["w1"].shape[1]
    C = params["wc"].shape[1]
    p1 = jnp.concatenate([params["b1"], params["g1"], params["be1"]], axis=0)
    p2 = jnp.concatenate([params["b2"], params["g2"], params["be2"]], axis=0)
    wc_pad = jnp.zeros((H, C_PAD), jnp.bfloat16).at[:, :C].set(
        params["wc"].astype(jnp.bfloat16))
    bc_pad = jnp.zeros((1, C_PAD), jnp.float32).at[:, :C].set(params["bc"])
    return {
        "w1": params["w1"].astype(jnp.bfloat16),   # (D_in, H) bf16 (half the DMA)
        "p1": p1,                                  # (3, H) f32: b1 / gamma1 / beta1
        "w2": params["w2"].astype(jnp.bfloat16),   # (H, H) bf16
        "p2": p2,                                  # (3, H) f32
        "wc": wc_pad,                              # (H, C_PAD) bf16, cols >= C are 0
        "bc": bc_pad,                              # (1, C_PAD) f32, cols >= C are 0
        "out_dim": C,
    }


def simplenet_forward(x, packed):
    """x: (B, input_dim) float32. Returns (features (B,H), output (B,C))."""
    B = x.shape[0]
    assert B > 1, "BatchNorm1d training-mode statistics require batch size > 1"
    H = packed["w1"].shape[1]
    C = packed["out_dim"]

    args = (x, packed["w1"], packed["p1"], packed["w2"], packed["p2"],
            packed["wc"], packed["bc"])
    vmem = pl.BlockSpec(memory_space=pltpu.MemorySpace.VMEM)

    feat, out_pad = pl.pallas_call(
        simplenet_kernel,
        out_shape=(jax.ShapeDtypeStruct((B, H), jnp.float32),
                   jax.ShapeDtypeStruct((B, C_PAD), jnp.float32)),
        in_specs=[vmem] * len(args),
        out_specs=(vmem, vmem),
    )(*args)
    return feat, out_pad[:, :C]


def init_params(key, input_dim=784, hidden_dim=128, output_dim=10):
    ks = jax.random.split(key, 6)
    scale1 = 1.0 / jnp.sqrt(input_dim)
    scale2 = 1.0 / jnp.sqrt(hidden_dim)
    return {
        # Linear 1 (stored (in, out); PyTorch stores (out, in) and does x @ W.T)
        "w1": jax.random.uniform(ks[0], (input_dim, hidden_dim), jnp.float32,
                                 -scale1, scale1),
        "b1": jax.random.uniform(ks[1], (1, hidden_dim), jnp.float32,
                                 -scale1, scale1),
        # BatchNorm 1 (PyTorch init: gamma=1, beta=0)
        "g1": jnp.ones((1, hidden_dim), jnp.float32),
        "be1": jnp.zeros((1, hidden_dim), jnp.float32),
        # Linear 2
        "w2": jax.random.uniform(ks[2], (hidden_dim, hidden_dim), jnp.float32,
                                 -scale2, scale2),
        "b2": jax.random.uniform(ks[3], (1, hidden_dim), jnp.float32,
                                 -scale2, scale2),
        # BatchNorm 2
        "g2": jnp.ones((1, hidden_dim), jnp.float32),
        "be2": jnp.zeros((1, hidden_dim), jnp.float32),
        # Classifier
        "wc": jax.random.uniform(ks[4], (hidden_dim, output_dim), jnp.float32,
                                 -scale2, scale2),
        "bc": jax.random.uniform(ks[5], (1, output_dim), jnp.float32,
                                 -scale2, scale2),
    }


if __name__ == "__main__":
    key = jax.random.PRNGKey(0)
    k_x, k_p = jax.random.split(key)

    B, D_IN, HID, OUT = 8, 784, 128, 10       # batch must be >1 for BatchNorm
    x = jax.random.normal(k_x, (B, D_IN), jnp.float32)
    params = init_params(k_p, D_IN, HID, OUT)
    packed = pack_params(params)

    features, output = simplenet_forward(x, packed)
    jax.block_until_ready((features, output))

    # Pure-JAX reference using the same bf16-rounded weights (MXU bf16 / f32
    # accumulate) and classic two-pass training-mode BatchNorm.
    def ref(x, p):
        def bn(h, g, b):
            m = h.mean(0, keepdims=True)
            v = ((h - m) ** 2).mean(0, keepdims=True)
            return (h - m) / jnp.sqrt(v + BN_EPS) * g + b
        h = jnp.dot(x.astype(jnp.bfloat16), p["w1"].astype(jnp.bfloat16),
                    preferred_element_type=jnp.float32) + p["b1"]
        h = jnp.maximum(bn(h, p["g1"], p["be1"]), 0.0)
        h = jnp.dot(h.astype(jnp.bfloat16), p["w2"].astype(jnp.bfloat16),
                    preferred_element_type=jnp.float32) + p["b2"]
        h = jnp.maximum(bn(h, p["g2"], p["be2"]), 0.0)
        o = jnp.dot(h.astype(jnp.bfloat16), p["wc"].astype(jnp.bfloat16),
                    preferred_element_type=jnp.float32) + p["bc"]
        return h, o

    f_ref, o_ref = ref(x, params)
    assert features.shape == (B, HID) and output.shape == (B, OUT)
    assert jnp.allclose(features, f_ref, atol=2e-3, rtol=2e-3)
    assert jnp.allclose(output, o_ref, atol=2e-3, rtol=2e-3)

    print("KERNEL_OK")
</pallas_src>

<mosaic_0001>
module attributes {stable_mosaic.version = 11 : i64} {
  func.func @simplenet_kernel(%arg0: memref<8x784xf32, #tpu.memory_space<vmem>>, %arg1: memref<784x128xbf16, #tpu.memory_space<vmem>>, %arg2: memref<3x128xf32, #tpu.memory_space<vmem>>, %arg3: memref<128x128xbf16, #tpu.memory_space<vmem>>, %arg4: memref<3x128xf32, #tpu.memory_space<vmem>>, %arg5: memref<128x128xbf16, #tpu.memory_space<vmem>>, %arg6: memref<1x128xf32, #tpu.memory_space<vmem>>, %arg7: memref<8x128xf32, #tpu.memory_space<vmem>>, %arg8: memref<8x128xf32, #tpu.memory_space<vmem>>) attributes {dimension_semantics = [], scalar_prefetch = 0 : i64, scratch_operands = 0 : i64, tpu.core_type = #tpu.core_type<tc>} {
    %c0 = arith.constant 0 : index
    %c0_0 = arith.constant 0 : index
    %0 = vector.load %arg0[%c0, %c0_0] : memref<8x784xf32, #tpu.memory_space<vmem>>, vector<8x784xf32>
    %c0_1 = arith.constant 0 : index
    %c0_2 = arith.constant 0 : index
    %1 = vector.load %arg2[%c0_1, %c0_2] : memref<3x128xf32, #tpu.memory_space<vmem>>, vector<3x128xf32>
    %c0_3 = arith.constant 0 : index
    %c0_4 = arith.constant 0 : index
    %2 = vector.load %arg4[%c0_3, %c0_4] : memref<3x128xf32, #tpu.memory_space<vmem>>, vector<3x128xf32>
    %3 = arith.truncf %0 : vector<8x784xf32> to vector<8x784xbf16>
    %c0_5 = arith.constant 0 : index
    %c0_6 = arith.constant 0 : index
    %4 = vector.load %arg1[%c0_5, %c0_6] : memref<784x128xbf16, #tpu.memory_space<vmem>>, vector<784x128xbf16>
    %cst = arith.constant dense<0.000000e+00> : vector<8x128xf32>
    %5 = tpu.matmul %3, %4, %cst {dimension_numbers = #tpu.dot_dimension_numbers<[1], [0], [0], [1], [0, 0, 1, 1], [], []>} : vector<8x784xbf16>, vector<784x128xbf16>, vector<8x128xf32> -> vector<8x128xf32>
    %6 = vector.extract_strided_slice %1 {offsets = [0, 0], sizes = [1, 128], strides = [1, 1]} : vector<3x128xf32> to vector<1x128xf32>
    %7 = vector.broadcast %6 : vector<1x128xf32> to vector<8x128xf32>
    %8 = arith.addf %5, %7 : vector<8x128xf32>
    %9 = vector.extract_strided_slice %1 {offsets = [1, 0], sizes = [1, 128], strides = [1, 1]} : vector<3x128xf32> to vector<1x128xf32>
    %10 = vector.extract_strided_slice %1 {offsets = [2, 0], sizes = [1, 128], strides = [1, 1]} : vector<3x128xf32> to vector<1x128xf32>
    %cst_7 = arith.constant dense<0.000000e+00> : vector<128xf32>
    %11 = vector.multi_reduction <add>, %8, %cst_7 [0] : vector<8x128xf32> to vector<128xf32>
    %12 = vector.shape_cast %11 : vector<128xf32> to vector<1x128xf32>
    %cst_8 = arith.constant 1.250000e-01 : f32
    %13 = vector.broadcast %cst_8 : f32 to vector<1x128xf32>
    %14 = arith.mulf %12, %13 : vector<1x128xf32>
    %15 = arith.mulf %8, %8 : vector<8x128xf32>
    %cst_9 = arith.constant dense<0.000000e+00> : vector<128xf32>
    %16 = vector.multi_reduction <add>, %15, %cst_9 [0] : vector<8x128xf32> to vector<128xf32>
    %17 = vector.shape_cast %16 : vector<128xf32> to vector<1x128xf32>
    %cst_10 = arith.constant 1.250000e-01 : f32
    %18 = vector.broadcast %cst_10 : f32 to vector<1x128xf32>
    %19 = arith.mulf %17, %18 : vector<1x128xf32>
    %20 = arith.mulf %14, %14 : vector<1x128xf32>
    %21 = arith.subf %19, %20 : vector<1x128xf32>
    %cst_11 = arith.constant 9.99999974E-6 : f32
    %22 = vector.broadcast %cst_11 : f32 to vector<1x128xf32>
    %23 = arith.addf %21, %22 : vector<1x128xf32>
    %24 = math.rsqrt %23 : vector<1x128xf32>
    %25 = arith.mulf %9, %24 : vector<1x128xf32>
    %26 = arith.mulf %14, %25 : vector<1x128xf32>
    %27 = arith.subf %10, %26 : vector<1x128xf32>
    %28 = vector.broadcast %25 : vector<1x128xf32> to vector<8x128xf32>
    %29 = arith.mulf %8, %28 : vector<8x128xf32>
    %30 = vector.broadcast %27 : vector<1x128xf32> to vector<8x128xf32>
    %31 = arith.addf %29, %30 : vector<8x128xf32>
    %cst_12 = arith.constant 0.000000e+00 : f32
    %32 = vector.broadcast %cst_12 : f32 to vector<8x128xf32>
    %33 = arith.maximumf %31, %32 : vector<8x128xf32>
    %34 = arith.truncf %33 : vector<8x128xf32> to vector<8x128xbf16>
    %c0_13 = arith.constant 0 : index
    %c0_14 = arith.constant 0 : index
    %35 = vector.load %arg3[%c0_13, %c0_14] : memref<128x128xbf16, #tpu.memory_space<vmem>>, vector<128x128xbf16>
    %cst_15 = arith.constant dense<0.000000e+00> : vector<8x128xf32>
    %36 = tpu.matmul %34, %35, %cst_15 {dimension_numbers = #tpu.dot_dimension_numbers<[1], [0], [0], [1], [0, 0, 1, 1], [], []>} : vector<8x128xbf16>, vector<128x128xbf16>, vector<8x128xf32> -> vector<8x128xf32>
    %37 = vector.extract_strided_slice %2 {offsets = [0, 0], sizes = [1, 128], strides = [1, 1]} : vector<3x128xf32> to vector<1x128xf32>
    %38 = vector.broadcast %37 : vector<1x128xf32> to vector<8x128xf32>
    %39 = arith.addf %36, %38 : vector<8x128xf32>
    %40 = vector.extract_strided_slice %2 {offsets = [1, 0], sizes = [1, 128], strides = [1, 1]} : vector<3x128xf32> to vector<1x128xf32>
    %41 = vector.extract_strided_slice %2 {offsets = [2, 0], sizes = [1, 128], strides = [1, 1]} : vector<3x128xf32> to vector<1x128xf32>
    %cst_16 = arith.constant dense<0.000000e+00> : vector<128xf32>
    %42 = vector.multi_reduction <add>, %39, %cst_16 [0] : vector<8x128xf32> to vector<128xf32>
    %43 = vector.shape_cast %42 : vector<128xf32> to vector<1x128xf32>
    %cst_17 = arith.constant 1.250000e-01 : f32
    %44 = vector.broadcast %cst_17 : f32 to vector<1x128xf32>
    %45 = arith.mulf %43, %44 : vector<1x128xf32>
    %46 = arith.mulf %39, %39 : vector<8x128xf32>
    %cst_18 = arith.constant dense<0.000000e+00> : vector<128xf32>
    %47 = vector.multi_reduction <add>, %46, %cst_18 [0] : vector<8x128xf32> to vector<128xf32>
    %48 = vector.shape_cast %47 : vector<128xf32> to vector<1x128xf32>
    %cst_19 = arith.constant 1.250000e-01 : f32
    %49 = vector.broadcast %cst_19 : f32 to vector<1x128xf32>
    %50 = arith.mulf %48, %49 : vector<1x128xf32>
    %51 = arith.mulf %45, %45 : vector<1x128xf32>
    %52 = arith.subf %50, %51 : vector<1x128xf32>
    %cst_20 = arith.constant 9.99999974E-6 : f32
    %53 = vector.broadcast %cst_20 : f32 to vector<1x128xf32>
    %54 = arith.addf %52, %53 : vector<1x128xf32>
    %55 = math.rsqrt %54 : vector<1x128xf32>
    %56 = arith.mulf %40, %55 : vector<1x128xf32>
    %57 = arith.mulf %45, %56 : vector<1x128xf32>
    %58 = arith.subf %41, %57 : vector<1x128xf32>
    %59 = vector.broadcast %56 : vector<1x128xf32> to vector<8x128xf32>
    %60 = arith.mulf %39, %59 : vector<8x128xf32>
    %61 = vector.broadcast %58 : vector<1x128xf32> to vector<8x128xf32>
    %62 = arith.addf %60, %61 : vector<8x128xf32>
    %cst_21 = arith.constant 0.000000e+00 : f32
    %63 = vector.broadcast %cst_21 : f32 to vector<8x128xf32>
    %64 = arith.maximumf %62, %63 : vector<8x128xf32>
    %c0_22 = arith.constant 0 : index
    %c0_23 = arith.constant 0 : index
    %65 = vector.load %arg7[%c0_22, %c0_23] : memref<8x128xf32, #tpu.memory_space<vmem>>, vector<8x128xf32>
    tpu.vector_store %arg7[%c0_22, %c0_23], %64 {strides = array<i32>} : memref<8x128xf32, #tpu.memory_space<vmem>>, vector<8x128xf32>,
    %66 = arith.truncf %64 : vector<8x128xf32> to vector<8x128xbf16>
    %c0_24 = arith.constant 0 : index
    %c0_25 = arith.constant 0 : index
    %67 = vector.load %arg5[%c0_24, %c0_25] : memref<128x128xbf16, #tpu.memory_space<vmem>>, vector<128x128xbf16>
    %cst_26 = arith.constant dense<0.000000e+00> : vector<8x128xf32>
    %68 = tpu.matmul %66, %67, %cst_26 {dimension_numbers = #tpu.dot_dimension_numbers<[1], [0], [0], [1], [0, 0, 1, 1], [], []>} : vector<8x128xbf16>, vector<128x128xbf16>, vector<8x128xf32> -> vector<8x128xf32>
    %c0_27 = arith.constant 0 : index
    %c0_28 = arith.constant 0 : index
    %69 = vector.load %arg6[%c0_27, %c0_28] : memref<1x128xf32, #tpu.memory_space<vmem>>, vector<1x128xf32>
    %70 = vector.broadcast %69 : vector<1x128xf32> to vector<8x128xf32>
    %71 = arith.addf %68, %70 : vector<8x128xf32>
    %c0_29 = arith.constant 0 : index
    %c0_30 = arith.constant 0 : index
    %72 = vector.load %arg8[%c0_29, %c0_30] : memref<8x128xf32, #tpu.memory_space<vmem>>, vector<8x128xf32>
    tpu.vector_store %arg8[%c0_29, %c0_30], %71 {strides = array<i32>} : memref<8x128xf32, #tpu.memory_space<vmem>>, vector<8x128xf32>,
    return
  }
}

</mosaic_0001>

<bundles_post_ra>
// kernel: tpu_custom_call.1
= control target key start
LH: loop header
LB: loop body
LE: loop exit
PB: predicated region body
PF: predicated region fallthrough
CT: control target
= control target key end

     0   :  { %14 = vsyncpa [#allocation3], 0  ;;  %s1591_s0 = inlined_call_operand.hbm [shape: f32[8,784], index: 0, kind: input, shape index: {}]   ;;  %s1592_s1 = inlined_call_operand.hbm [shape: bf16[784,128], index: 1, kind: input, shape index: {}]   ;;  %s1593_s2 = inlined_call_operand.vmem [shape: f32[3,128], index: 2, kind: input, shape index: {}]   ;;  %s1594_s3 = inlined_call_operand.hbm [shape: bf16[128,128], index: 3, kind: input, shape index: {}]   ;;  %s1595_s4 = inlined_call_operand.vmem [shape: f32[3,128], index: 4, kind: input, shape index: {}]   ;;  %s1596_s5 = inlined_call_operand.hbm [shape: bf16[128,128], index: 5, kind: input, shape index: {}]   ;;  %s1597_s6 = inlined_call_operand.vmem [shape: f32[1,128], index: 6, kind: input, shape index: {}]   ;;  %s1598_s7 = inlined_call_operand.hbm [shape: f32[8,128], index: 7, kind: output, shape index: {0}]   ;;  %s1599_s8 = inlined_call_operand.hbm [shape: f32[8,128], index: 8, kind: output, shape index: {1}]  }
   0x1   :  { %15 = vsyncpa [#allocation6], 0 }
   0x2   :  { %16 = vsyncpa [#allocation9], 0 }
   0x3   :  { %17 = vsyncpa [#allocation4], 0 }
   0x4   :  { %18 = vsyncpa [#allocation12], 0  ;;  %s1406_s27 = smov [#allocation5]   ;;  %s1264_s9 = scalar_lea.hbm %s1592_s1, 6272 }
   0x5   :  { %s34_s28 = sshll.u32 %s1406_s27, 4  ;;  %p1265_p0 = scmp.ne.s32.totalorder %s1592_s1, %s1264_s9  ;;  %s35_s28 = int_to_ptr.vmem [resolvable:$true] %s34_s28 }
   0x6   :  { %p1268_p1 = scmp.lt.u32.totalorder %s1264_s9, %s1592_s1 }
   0x8   :  { %p1270_p2 = pnand %p1268_p1, %p1265_p0 }
   0xa   :  { %1273 = shalt.err (!%p1270_p2)
}
   0xb   :  { %s1274_s14 = scalar_lea.vmem %s35_s28, 6272  ;;  %p1279_p4 = scmp.lt.s32.totalorder %s35_s28, %s35_s28 }
   0xc   :  { %p1275_p3 = scmp.ne.s32.totalorder %s35_s28, %s1274_s14  ;;  %p1280_p5 = scmp.lt.s32.totalorder %s1274_s14, %s1274_s14 }
   0xe   :  { %p1281_p6 = por %p1280_p5, %p1279_p4 }
  0x10   :  { %p1282_p7 = pnand %p1281_p6, %p1275_p3 }
  0x12   :  { %1285 = shalt.err (!%p1282_p7)
}
  0x13   :  { %s1407_s15 = smov 64   ;;  %s1408_s16 = smov 4  }
  0x14   :  { %40 = dma.hbm_to_vmem [thread:$0]  %s1592_s1, 6272, %s35_s28, [#allocation6], %s1407_s15, %s1407_s15, %s1408_s16  }
  0x15   :  { %s1409_s19 = smov [#allocation2]   ;;  %s1410_s21 = smov [#allocation7]  }
  0x16   :  { %s25_s20 = sshll.u32 %s1409_s19, 4  ;;  %s48_s22 = sshll.u32 %s1410_s21, 4  ;;  %s26_s20 = int_to_ptr.vmem [resolvable:$true] %s25_s20  ;;  %s49_s22 = int_to_ptr.vmem [resolvable:$true] %s48_s22 }
  0x17   :  { %s1286_s25 = scalar_lea.hbm %s1591_s0, 896 }
  0x18   :  { %p1287_p8 = scmp.ne.s32.totalorder %s1591_s0, %s1286_s25  ;;  %p1290_p9 = scmp.lt.u32.totalorder %s1286_s25, %s1591_s0 }
  0x1a   :  { %p1292_p10 = pnand %p1290_p9, %p1287_p8 }
  0x1c   :  { %1295 = shalt.err (!%p1292_p10)
}
  0x1d   :  { %s1296_s1 = scalar_lea.vmem %s26_s20, 896  ;;  %p1301_p12 = scmp.lt.s32.totalorder %s26_s20, %s26_s20 }
  0x1e   :  { %p1297_p11 = scmp.ne.s32.totalorder %s26_s20, %s1296_s1  ;;  %p1302_p13 = scmp.lt.s32.totalorder %s1296_s1, %s1296_s1 }
  0x20   :  { %p1303_p0 = por %p1302_p13, %p1301_p12 }
  0x22   :  { %p1304_p1 = pnand %p1303_p0, %p1297_p11 }
  0x24   :  { %1307 = shalt.err (!%p1304_p1)
}
  0x25   :  { %28 = dma.hbm_to_vmem [thread:$0]  %s1591_s0, 896, %s26_s20, [#allocation3]  }
  0x26   :  { %s1308_s12 = scalar_lea.hbm %s1594_s3, 1024 }
  0x27   :  { %p1309_p2 = scmp.ne.s32.totalorder %s1594_s3, %s1308_s12  ;;  %p1312_p3 = scmp.lt.u32.totalorder %s1308_s12, %s1594_s3 }
  0x29   :  { %p1314_p4 = pnand %p1312_p3, %p1309_p2 }
  0x2b   :  { %1317 = shalt.err (!%p1314_p4)
}
  0x2c   :  { %s1318_s19 = scalar_lea.vmem %s49_s22, 1024  ;;  %p1323_p6 = scmp.lt.s32.totalorder %s49_s22, %s49_s22 }
  0x2d   :  { %p1319_p5 = scmp.ne.s32.totalorder %s49_s22, %s1318_s19  ;;  %p1324_p7 = scmp.lt.s32.totalorder %s1318_s19, %s1318_s19 }
  0x2f   :  { %p1325_p8 = por %p1324_p7, %p1323_p6 }
  0x31   :  { %p1326_p9 = pnand %p1325_p8, %p1319_p5 }
  0x33   :  { %1329 = shalt.err (!%p1326_p9)
}
  0x34   :  { %54 = dma.hbm_to_vmem [thread:$0]  %s1594_s3, 1024, %s49_s22, [#allocation6], %s1407_s15, %s1407_s15, %s1408_s16  }
  0x35   :  { %s1411_s21 = smov [#allocation8]   ;;  %s1330_s26 = scalar_lea.hbm %s1596_s5, 1024 }
  0x36   :  { %s62_s23 = sshll.u32 %s1411_s21, 4  ;;  %p1331_p10 = scmp.ne.s32.totalorder %s1596_s5, %s1330_s26  ;;  %s63_s23 = int_to_ptr.vmem [resolvable:$true] %s62_s23 }
  0x37   :  { %p1334_p11 = scmp.lt.u32.totalorder %s1330_s26, %s1596_s5 }
  0x39   :  { %p1336_p12 = pnand %p1334_p11, %p1331_p10 }
  0x3b   :  { %1339 = shalt.err (!%p1336_p12)
}
  0x3c   :  { %s1340_s28 = scalar_lea.vmem %s63_s23, 1024  ;;  %p1345_p0 = scmp.lt.s32.totalorder %s63_s23, %s63_s23 }
  0x3d   :  { %p1341_p13 = scmp.ne.s32.totalorder %s63_s23, %s1340_s28  ;;  %p1346_p1 = scmp.lt.s32.totalorder %s1340_s28, %s1340_s28 }
  0x3f   :  { %p1347_p2 = por %p1346_p1, %p1345_p0 }
  0x41   :  { %p1348_p3 = pnand %p1347_p2, %p1341_p13 }
  0x43   :  { %1351 = shalt.err (!%p1348_p3)
}
  0x44   :  { %68 = dma.hbm_to_vmem [thread:$0]  %s1596_s5, 1024, %s63_s23, [#allocation9], %s1407_s15, %s1407_s15, %s1408_s16  }
  0x45   :  { %1396 = dma.done.wait [#allocation3], 896  }
  0x46   :  { %1397 = vsyncadd [#allocation3], 4294966400 }
  0x47   :  { %1398 = dma.done.wait [#allocation6], 7296  }
  0x48   :  { %1399 = vsyncadd [#allocation6], 4294960000 }
  0x49   :  { %1400 = dma.done.wait [#allocation9], 1024  }
  0x4a   :  { %1401 = vsyncadd [#allocation9], 4294966272  ;;  %v1195_v0 = vld [vmem:[#allocation5 + $0x40] sm:$0xff]   ;;  %v1199_v4 = vld [vmem:[#allocation5 + $0x48] sm:$0xff]   ;;  %v1412_v44 = vmov 0.0   ;;  %vm1413_vm0 = vmmov 0  }
  0x4b   :  { %v1196_v1 = vld [vmem:[#allocation5] sm:$0xff]   ;;  %1053 = vmatprep.subr.bf16.mxu0 %v1195_v0  ;;  %v1200_v5 = vld [vmem:[#allocation5 + $0x8] sm:$0xff]   ;;  %v1203_v8 = vld [vmem:[#allocation5 + $0x50] sm:$0xff]   ;;  %vm496_vm1 = vcmask 130048  }
  0x4c   :  { %v1197_v2 = vld [vmem:[#allocation5 + $0xc0] sm:$0xff]   ;;  %1054 = vmatpush3.bf16.msra.mxu0 %v1196_v1  ;;  %v1201_v6 = vld [vmem:[#allocation5 + $0xc8] sm:$0xff]   ;;  %v1204_v9 = vld [vmem:[#allocation5 + $0x10] sm:$0xff]  }
  0x4d   :  { %v1198_v3 = vld [vmem:[#allocation5 + $0x80] sm:$0xff]   ;;  %1075 = vmatprep.subr.bf16.mxu1 %v1197_v2  ;;  %1055 = vmatprep.subr.bf16.mxu0 %v1199_v4  ;;  %v1202_v7 = vld [vmem:[#allocation5 + $0x88] sm:$0xff]   ;;  %v1205_v10 = vld [vmem:[#allocation5 + $0xd0] sm:$0xff]  }
  0x4e   :  { %1076 = vmatpush3.bf16.msra.mxu1 %v1198_v3  ;;  %v1206_v11 = vld [vmem:[#allocation5 + $0x90] sm:$0xff]   ;;  %v1207_v12 = vld [vmem:[#allocation5 + $0x58] sm:$0xff]   ;;  %v1211_v16 = vld [vmem:[#allocation5 + $0x60] sm:$0xff]  }
  0x4f   :  { %1077 = vmatprep.subr.bf16.mxu1 %v1201_v6  ;;  %v1208_v13 = vld [vmem:[#allocation5 + $0x18] sm:$0xff]   ;;  %v1212_v17 = vld [vmem:[#allocation5 + $0x20] sm:$0xff]   ;;  %v1215_v20 = vld [vmem:[#allocation5 + $0x68] sm:$0xff]  }
  0x50   :  { %1056 = vmatpush3.bf16.msra.mxu0 %v1200_v5  ;;  %v1209_v14 = vld [vmem:[#allocation5 + $0xd8] sm:$0xff]   ;;  %v1213_v18 = vld [vmem:[#allocation5 + $0xe0] sm:$0xff]   ;;  %v1216_v21 = vld [vmem:[#allocation5 + $0x28] sm:$0xff]  }
  0x51   :  { %1057 = vmatprep.subr.bf16.mxu0 %v1203_v8  ;;  %v1210_v15 = vld [vmem:[#allocation5 + $0x98] sm:$0xff]   ;;  %v1214_v19 = vld [vmem:[#allocation5 + $0xa0] sm:$0xff]   ;;  %v1217_v22 = vld [vmem:[#allocation5 + $0xe8] sm:$0xff]   ;;  %v198_v8 = vlaneseq }
  0x52   :  { %1078 = vmatpush3.bf16.msra.mxu1 %v1202_v7  ;;  %v1218_v23 = vld [vmem:[#allocation5 + $0xa8] sm:$0xff]   ;;  %v1219_v24 = vld [vmem:[#allocation5 + $0x70] sm:$0xff]   ;;  %v1223_v28 = vld [vmem:[#allocation5 + $0x78] sm:$0xff]  }
  0x53   :  { %1079 = vmatprep.subr.bf16.mxu1 %v1205_v10  ;;  %v1220_v25 = vld [vmem:[#allocation5 + $0x30] sm:$0xff]   ;;  %v1224_v29 = vld [vmem:[#allocation5 + $0x38] sm:$0xff]   ;;  %v84_v34 = vld [vmem:[#allocation2] sm:$0xff] }
  0x54   :  { %1058 = vmatpush3.bf16.msra.mxu0 %v1204_v9  ;;  %v1221_v26 = vld [vmem:[#allocation5 + $0xf0] sm:$0xff]   ;;  %v1225_v30 = vld [vmem:[#allocation5 + $0xf8] sm:$0xff]   ;;  %v93_v35 = vpack.c.bf16 %v84_v34, %v84_v34  ;;  %v1227_v36 = vld [vmem:[#allocation5 + $0x140] sm:$0xff]   ;;  %v1534_v9 = vshrl.u32 %v198_v8, 7 }
  0x55   :  { %1059 = vmatprep.subr.bf16.mxu0 %v1207_v12  ;;  %v1222_v27 = vld [vmem:[#allocation5 + $0xb0] sm:$0xff]   ;;  %v1226_v33 = vld [vmem:[#allocation5 + $0xb8] sm:$0xff]   ;;  %v87_v37 = vld [vmem:[#allocation2 + $0x18] sm:$0xff] }
  0x56   :  { %1080 = vmatpush3.bf16.msra.mxu1 %v1206_v11  ;;  %v85_v31 = vld [vmem:[#allocation2 + $0x8] sm:$0xff]  ;;  %v96_v38 = vpack.c.bf16 %v87_v37, %v87_v37  ;;  %v1228_v39 = vld [vmem:[#allocation5 + $0x100] sm:$0xff]   ;;  %v86_v40 = vld [vmem:[#allocation2 + $0x10] sm:$0xff]  ;;  %v200_v10 = vsub.s32 0, %v1534_v9 }
  0x57   :  { %1081 = vmatprep.subr.bf16.mxu1 %v1209_v14  ;;  %v94_v32 = vpack.c.bf16 %v85_v31, %v85_v31  ;;  %v95_v41 = vpack.c.bf16 %v86_v40, %v86_v40  ;;  %v1229_v42 = vld [vmem:[#allocation5 + $0x148] sm:$0xff]   ;;  %v1231_v45 = vld [vmem:[#allocation5 + $0x150] sm:$0xff]   ;;  %v1233_v47 = vld [vmem:[#allocation5 + $0x158] sm:$0xff]  }
  0x58   :  { %1060 = vmatpush3.bf16.msra.mxu0 %v1208_v13  ;;  %572 = vmatprep.mubr.bf16.mxu1 %v96_v38  ;;  %v1230_v43 = vld [vmem:[#allocation5 + $0x108] sm:$0xff]   ;;  %v1232_v46 = vld [vmem:[#allocation5 + $0x110] sm:$0xff]   ;;  %v1234_v48 = vld [vmem:[#allocation5 + $0x118] sm:$0xff]  }
  0x59   :  { %1061 = vmatprep.subr.bf16.mxu0 %v1211_v16  ;;  %532 = vmatprep.mubr.bf16.mxu0 %v94_v32  ;;  %v1235_v49 = vld [vmem:[#allocation5 + $0x160] sm:$0xff]   ;;  %v1237_v51 = vld [vmem:[#allocation5 + $0x168] sm:$0xff]   ;;  %v89_v54 = vld [vmem:[#allocation2 + $0x28] sm:$0xff] }
  0x5a   :  { %1082 = vmatpush3.bf16.msra.mxu1 %v1210_v15  ;;  %v1236_v50 = vld [vmem:[#allocation5 + $0x120] sm:$0xff]   ;;  %v1238_v52 = vld [vmem:[#allocation5 + $0x128] sm:$0xff]   ;;  %v1239_v55 = vld [vmem:[#allocation5 + $0x170] sm:$0xff]   ;;  %v98_v56 = vpack.c.bf16 %v89_v54, %v89_v54 }
  0x5b   :  { %1083 = vmatprep.subr.bf16.mxu1 %v1213_v18  ;;  %v1243_v53 = vld [vmem:[#allocation5 + $0x180] sm:$0xff]   ;;  %v90_v57 = vld [vmem:[#allocation2 + $0x30] sm:$0xff]  ;;  %v1240_v59 = vld [vmem:[#allocation5 + $0x130] sm:$0xff]  }
  0x5c   :  { %1062 = vmatpush3.bf16.msra.mxu0 %v1212_v17  ;;  %v99_v58 = vpack.c.bf16 %v90_v57, %v90_v57  ;;  %v1241_v60 = vld [vmem:[#allocation5 + $0x178] sm:$0xff]   ;;  %v88_v62 = vld [vmem:[#allocation2 + $0x20] sm:$0xff]  ;;  %v1245_v1 = vld [vmem:[#allocation7 + $0x8] sm:$0xff]   ;;  %v687_v57 = vsub.s32 1, %v1534_v9 }
  0x5d   :  { %1063 = vmatprep.subr.bf16.mxu0 %v1215_v20  ;;  %v1242_v61 = vld [vmem:[#allocation5 + $0x138] sm:$0xff]   ;;  %v97_v63 = vpack.c.bf16 %v88_v62, %v88_v62  ;;  %v1244_v0 = vld [vmem:[#allocation7] sm:$0xff]   ;;  %v1247_v3 = vld [vmem:[#allocation7 + $0x18] sm:$0xff]  }
  0x5e   :  { %1084 = vmatpush3.bf16.msra.mxu1 %v1214_v19  ;;  %v1246_v2 = vld [vmem:[#allocation7 + $0x10] sm:$0xff]   ;;  %v1248_v4 = vld [vmem:[#allocation7 + $0x20] sm:$0xff]   ;;  %v1249_v5 = vld [vmem:[#allocation7 + $0x28] sm:$0xff]  }
  0x5f   :  { %1085 = vmatprep.subr.bf16.mxu1 %v1217_v22  ;;  %v1250_v6 = vld [vmem:[#allocation7 + $0x30] sm:$0xff]   ;;  %v1251_v7 = vld [vmem:[#allocation7 + $0x38] sm:$0xff]   ;;  %v91_v11 = vld [vmem:[%s1593_s2] sm:$0x7] }
  0x60   :  { %1064 = vmatpush3.bf16.msra.mxu0 %v1216_v21  ;;  %v201_v13 = vrot.slane %v91_v11, %v200_v10  ;;  %v1256_v8 = vld [vmem:[#allocation8 + $0x20] sm:$0xff]  }
  0x61   :  { %1065 = vmatprep.subr.bf16.mxu0 %v1219_v24 }
  0x62   :  { %1086 = vmatpush3.bf16.msra.mxu1 %v1218_v23 }
  0x63   :  { %1087 = vmatprep.subr.bf16.mxu1 %v1221_v26 }
  0x64   :  { %1066 = vmatpush3.bf16.msra.mxu0 %v1220_v25 }
  0x65   :  { %1067 = vmatprep.subr.bf16.mxu0 %v1223_v28 }
  0x66   :  { %1088 = vmatpush3.bf16.msra.mxu1 %v1222_v27 }
  0x67   :  { %1089 = vmatprep.subr.bf16.mxu1 %v1225_v30 }
  0x68   :  { %1068 = vmatpush3.bf16.msra.mxu0 %v1224_v29 }
  0x69   :  { %1097 = vmatprep.subr.bf16.mxu0 %v1227_v36 }
  0x6a   :  { %1090 = vmatpush3.bf16.msra.mxu1 %v1226_v33 }
  0x6b   :  { %533 = vmatmul.mubr.bf16.vlgmr.msra.gmra.mrb[0].mxu0 %v93_v35  ;;  %1139 = vmatprep.subr.bf16.mxu1 %v1412_v44 }
  0x6c   :  { %1098 = vmatpush3.bf16.msra.mxu0 %v1228_v39  ;;  %612 = vmatprep.mubr.bf16.mxu0 %v98_v56 }
  0x6d   :  { %573 = vmatmul.mubr.bf16.vlgmr.msra.gmra.mrb[0].mxu1 %v95_v41  ;;  %1099 = vmatprep.subr.bf16.mxu0 %v1229_v42 }
  0x6e   :  { %1141 = vmatprep.mubr.msk.bf16.mxu1 %vm1413_vm0, %v1412_v44  ;;  %1140 = vmatpush3.bf16.msra.mxu1 %v1243_v53 }
  0x6f   :  { %1145 = vmatprep.subr.bf16.mxu1 %v1412_v44 }
  0x70   :  { %1100 = vmatpush3.bf16.msra.mxu0 %v1230_v43 }
  0x71   :  { %1101 = vmatprep.subr.bf16.mxu0 %v1231_v45 }
  0x74   :  { %1102 = vmatpush3.bf16.msra.mxu0 %v1232_v46 }
  0x75   :  { %1103 = vmatprep.subr.bf16.mxu0 %v1233_v47  ;;  %1142 = vmatmul.mubr.msk.bf16.vlgmr.msra.gmra.mrb[4].mxu1 %vm496_vm1, %v99_v58 }
  0x76   :  { %1161 = vmatprep.mubr.msk.bf16.mxu1 %vm1413_vm0, %v1412_v44  ;;  %1146 = vmatpush3.bf16.msra.mxu1 %v1244_v0 }
  0x77   :  { %1147 = vmatprep.subr.bf16.mxu1 %v1412_v44 }
  0x78   :  { %1104 = vmatpush3.bf16.msra.mxu0 %v1234_v48 }
  0x79   :  { %1105 = vmatprep.subr.bf16.mxu0 %v1235_v49 }
  0x7a   :  { %1148 = vmatpush3.bf16.msra.mxu1 %v1245_v1 }
  0x7b   :  { %1149 = vmatprep.subr.bf16.mxu1 %v1412_v44 }
  0x7c   :  { %1106 = vmatpush3.bf16.msra.mxu0 %v1236_v50 }
  0x7d   :  { %1107 = vmatprep.subr.bf16.mxu0 %v1237_v51 }
  0x7e   :  { %1150 = vmatpush3.bf16.msra.mxu1 %v1246_v2 }
  0x7f   :  { %1151 = vmatprep.subr.bf16.mxu1 %v1412_v44 }
  0x80   :  { %1108 = vmatpush3.bf16.msra.mxu0 %v1238_v52 }
  0x81   :  { %1109 = vmatprep.subr.bf16.mxu0 %v1239_v55 }
  0x82   :  { %1152 = vmatpush3.bf16.msra.mxu1 %v1247_v3 }
  0x83   :  { %1153 = vmatprep.subr.bf16.mxu1 %v1412_v44 }
  0x84   :  { %1110 = vmatpush3.bf16.msra.mxu0 %v1240_v59 }
  0x85   :  { %1111 = vmatprep.subr.bf16.mxu0 %v1241_v60 }
  0x86   :  { %1154 = vmatpush3.bf16.msra.mxu1 %v1248_v4  ;;  %v1252_v4 = vld [vmem:[#allocation8] sm:$0xff]  }
  0x87   :  { %1155 = vmatprep.subr.bf16.mxu1 %v1412_v44 }
  0x88   :  { %1112 = vmatpush3.bf16.msra.mxu0 %v1242_v61  ;;  %v692_v61 = vsub.s32 2, %v1534_v9 }
  0x89   :  { %1165 = vmatprep.subr.bf16.mxu0 %v1412_v44 }
  0x8a   :  { %1156 = vmatpush3.bf16.msra.mxu1 %v1249_v5  ;;  %v1253_v5 = vld [vmem:[#allocation8 + $0x8] sm:$0xff]  }
  0x8b   :  { %613 = vmatmul.mubr.bf16.vlgmr.msra.gmra.mrb[4].mxu0 %v97_v63  ;;  %1157 = vmatprep.subr.bf16.mxu1 %v1412_v44 }
  0x8c   :  { %1181 = vmatprep.mubr.msk.bf16.mxu0 %vm1413_vm0, %v1412_v44  ;;  %1166 = vmatpush3.bf16.msra.mxu0 %v1252_v4 }
  0x8d   :  { %1167 = vmatprep.subr.bf16.mxu0 %v1412_v44 }
  0x8e   :  { %1158 = vmatpush3.bf16.msra.mxu1 %v1250_v6  ;;  %v1254_v6 = vld [vmem:[#allocation8 + $0x10] sm:$0xff]  }
  0x8f   :  { %1159 = vmatprep.subr.bf16.mxu1 %v1412_v44 }
  0x90   :  { %1168 = vmatpush3.bf16.msra.mxu0 %v1253_v5 }
  0x91   :  { %1169 = vmatprep.subr.bf16.mxu0 %v1412_v44 }
  0x92   :  { %1160 = vmatpush3.bf16.msra.mxu1 %v1251_v7  ;;  %v1255_v7 = vld [vmem:[#allocation8 + $0x18] sm:$0xff]  }
  0x94   :  { %1170 = vmatpush3.bf16.msra.mxu0 %v1254_v6 }
  0x95   :  { %1171 = vmatprep.subr.bf16.mxu0 %v1412_v44 }
  0x98   :  { %1172 = vmatpush3.bf16.msra.mxu0 %v1255_v7 }
  0x99   :  { %1173 = vmatprep.subr.bf16.mxu0 %v1412_v44 }
  0x9c   :  { %1174 = vmatpush3.bf16.msra.mxu0 %v1256_v8 }
  0x9d   :  { %1175 = vmatprep.subr.bf16.mxu0 %v1412_v44 }
 0x13e   :  { %v1069_v12 = vpop.f32.mrb[0].mxu0 }
 0x13f   :  { %v1070_v14 = vpop.f32.mrb[1].mxu0 }
 0x140   :  { %v1071_v15 = vadd.f32 %v1070_v14, %v1069_v12  ;;  %v1072_v16 = vpop.f32.mrb[2].mxu0  ;;  %v1091_v17 = vpop.f32.mrb[0].mxu1  ;;  %v1258_v12 = vld [vmem:[#allocation8 + $0x30] sm:$0xff]   ;;  %v92_v14 = vld [vmem:[%s1595_s4] sm:$0x7]  ;;  %s1414_s4 = smov [#allocation10]  }
 0x141   :  { %v1073_v18 = vpop.f32.mrb[3].mxu0  ;;  %v1092_v20 = vpop.f32.mrb[1].mxu1  ;;  %s961_s9 = sshll.u32 %s1414_s4, 4  ;;  %s962_s9 = int_to_ptr.vmem [resolvable:$true] %s961_s9 }
 0x142   :  { %v535_v19 = vadd.f32 %v1071_v15, %v201_v13  ;;  %v1093_v21 = vadd.f32 %v1092_v20, %v1091_v17  ;;  %v1094_v22 = vpop.f32.mrb[2].mxu1  ;;  %v1259_v13 = vld [vmem:[#allocation8 + $0x38] sm:$0xff]   ;;  %v716_v15 = vrot.slane %v92_v14, %v200_v10  ;;  %s1352_s10 = scalar_lea.vmem %s962_s9, 128  ;;  %p1357_p5 = scmp.lt.s32.totalorder %s962_s9, %s962_s9 }
 0x143   :  { %v1095_v23 = vpop.f32.mrb[3].mxu1  ;;  %p1353_p4 = scmp.ne.s32.totalorder %s962_s9, %s1352_s10  ;;  %p1358_p6 = scmp.lt.s32.totalorder %s1352_s10, %s1352_s10 }
 0x144   :  { %v575_v24 = vadd.f32 %v1093_v21, %v535_v19 }
 0x145   :  { %p1359_p7 = por %p1358_p6, %p1357_p5 }
 0x147   :  { %p1360_p8 = pnand %p1359_p7, %p1353_p4 }
 0x148   :  { %v654_v25 = vpop.f32.mrb[4].mxu1 }
 0x149   :  { %v1143_v26 = vpop.f32.mrb[5].mxu1 }
 0x14a   :  { %v657_v27 = vpop.f32.mrb[6].mxu1 }
 0x14b   :  { %v1144_v28 = vpop.f32.mrb[7].mxu1 }
 0x15e   :  { %v1113_v29 = vpop.f32.mrb[4].mxu0 }
 0x15f   :  { %v1114_v30 = vpop.f32.mrb[5].mxu0 }
 0x160   :  { %v1115_v31 = vadd.f32 %v1114_v30, %v1113_v29  ;;  %v1116_v32 = vpop.f32.mrb[6].mxu0 }
 0x161   :  { %v1117_v33 = vpop.f32.mrb[7].mxu0 }
 0x162   :  { %v615_v34 = vadd.f32 %v1115_v31, %v575_v24 }
 0x164   :  { %v655_v35 = vadd.f32 %v654_v25, %v615_v34 }
 0x166   :  { %v660_v36 = vrot.slane %v655_v35, 4  ;;  %v667_v37 = vmul.f32 %v655_v35, %v655_v35 }
 0x168   :  { %v661_v38 = vadd.f32 %v660_v36, %v655_v35  ;;  %v668_v39 = vrot.slane %v667_v37, 4 }
 0x16a   :  { %v662_v40 = vrot.slane %v661_v38, 2  ;;  %v669_v41 = vadd.f32 %v668_v39, %v667_v37 }
 0x16c   :  { %v663_v42 = vadd.f32 %v662_v40, %v661_v38  ;;  %v670_v43 = vrot.slane %v669_v41, 2 }
 0x16e   :  { %v664_v45 = vrot.slane %v663_v42, 1  ;;  %v671_v46 = vadd.f32 %v670_v43, %v669_v41 }
 0x170   :  { %v665_v47 = vadd.f32 %v664_v45, %v663_v42  ;;  %v672_v48 = vrot.slane %v671_v46, 1 }
 0x172   :  { %v666_v49 = vmul.f32 0.125, %v665_v47  ;;  %v673_v50 = vadd.f32 %v672_v48, %v671_v46 }
 0x174   :  { %v674_v51 = vmul.f32 0.125, %v673_v50  ;;  %v675_v52 = vmul.f32 %v666_v49, %v666_v49 }
 0x176   :  { %v676_v53 = vsub.f32 %v674_v51, %v675_v52 }
 0x178   :  { %v677_v54 = vadd.f32 1e-05, %v676_v53 }
 0x17a   :  { %1260 = vrsqrt.f32 %v677_v54 }
 0x184   :  { %v1261_v55 = vpop.eup %1260 }
 0x185   :  { %v679_v56 = vmul.f32 %v1261_v55, %v91_v11 }
 0x187   :  { %v680_v58 = vmul.f32 %v679_v56, %v666_v49  ;;  %v688_v59 = vrot.slane %v679_v56, %v687_v57 }
 0x189   :  { %v682_v60 = vrot.slane %v680_v58, 7  ;;  %v689_v63 = vmul.f32 %v688_v59, %v655_v35 }
 0x18b   :  { %v684_v62 = vsub.f32 %v91_v11, %v682_v60  ;;  %v1257_v11 = vld [vmem:[#allocation8 + $0x28] sm:$0xff]  }
 0x18c   :  { %1176 = vmatpush3.bf16.msra.mxu0 %v1257_v11 }
 0x18d   :  { %v693_v0 = vrot.slane %v684_v62, %v692_v61  ;;  %1177 = vmatprep.subr.bf16.mxu0 %v1412_v44 }
 0x18f   :  { %v694_v1 = vadd.f32 %v693_v0, %v689_v63 }
 0x190   :  { %1178 = vmatpush3.bf16.msra.mxu0 %v1258_v12 }
 0x191   :  { %v695_v2 = vmax.f32 %v694_v1, 0.0  ;;  %1179 = vmatprep.subr.bf16.mxu0 %v1412_v44 }
 0x193   :  { %v696_v3 = vpack.c.bf16 %v695_v2, %v695_v2 }
 0x194   :  { %1180 = vmatpush3.bf16.msra.mxu0 %v1259_v13 }
 0x195   :  { %1162 = vmatmul.mubr.bf16.vlgmr.msra.gmra.mrb[8].mxu1 %v696_v3 }
 0x268   :  { %v799_v16 = vpop.f32.mrb[8].mxu1 }
 0x269   :  { %v800_v17 = vadd.f32 %v799_v16, %v716_v15  ;;  %v1163_v18 = vpop.f32.mrb[9].mxu1 }
 0x26a   :  { %v802_v19 = vpop.f32.mrb[10].mxu1 }
 0x26b   :  { %v805_v20 = vrot.slane %v800_v17, 4  ;;  %v812_v21 = vmul.f32 %v800_v17, %v800_v17  ;;  %v1164_v22 = vpop.f32.mrb[11].mxu1 }
 0x26d   :  { %v806_v23 = vadd.f32 %v805_v20, %v800_v17  ;;  %v813_v24 = vrot.slane %v812_v21, 4 }
 0x26f   :  { %v807_v25 = vrot.slane %v806_v23, 2  ;;  %v814_v26 = vadd.f32 %v813_v24, %v812_v21 }
 0x271   :  { %v808_v44 = vadd.f32 %v807_v25, %v806_v23  ;;  %v815_v27 = vrot.slane %v814_v26, 2 }
 0x273   :  { %v809_v28 = vrot.slane %v808_v44, 1  ;;  %v816_v29 = vadd.f32 %v815_v27, %v814_v26 }
 0x275   :  { %v810_v30 = vadd.f32 %v809_v28, %v808_v44  ;;  %v817_v31 = vrot.slane %v816_v29, 1 }
 0x277   :  { %v811_v32 = vmul.f32 0.125, %v810_v30  ;;  %v818_v33 = vadd.f32 %v817_v31, %v816_v29 }
 0x279   :  { %v819_v10 = vmul.f32 0.125, %v818_v33  ;;  %v820_v34 = vmul.f32 %v811_v32, %v811_v32 }
 0x27b   :  { %v821_v35 = vsub.f32 %v819_v10, %v820_v34 }
 0x27d   :  { %v822_v36 = vadd.f32 1e-05, %v821_v35 }
 0x27f   :  { %1262 = vrsqrt.f32 %v822_v36 }
 0x289   :  { %v1263_v37 = vpop.eup %1262 }
 0x28a   :  { %v824_v38 = vmul.f32 %v1263_v37, %v92_v14 }
 0x28c   :  { %v825_v39 = vmul.f32 %v824_v38, %v811_v32  ;;  %v833_v41 = vrot.slane %v824_v38, %v687_v57 }
 0x28e   :  { %v827_v40 = vrot.slane %v825_v39, 7  ;;  %v834_v43 = vmul.f32 %v833_v41, %v800_v17 }
 0x290   :  { %v829_v42 = vsub.f32 %v92_v14, %v827_v40 }
 0x292   :  { %v838_v45 = vrot.slane %v829_v42, %v692_v61 }
 0x294   :  { %v839_v46 = vadd.f32 %v838_v45, %v834_v43 }
 0x296   :  { %v840_v47 = vmax.f32 %v839_v46, 0.0 }
 0x298   :  { %v842_v48 = vpack.c.bf16 %v840_v47, %v840_v47  ;;  %841 = vst [vmem:[#allocation10] sm:$0xff] %v840_v47 }
 0x29a   :  { %1182 = vmatmul.mubr.bf16.vlgmr.msra.gmra.mrb[8].mxu0 %v842_v48 }
 0x29b   :  { %1363 = shalt.err (!%p1360_p8)
}
 0x29c   :  { %s1364_s13 = scalar_lea.hbm %s1598_s7, 128 }
 0x29d   :  { %p1365_p9 = scmp.ne.s32.totalorder %s1598_s7, %s1364_s13  ;;  %p1368_p10 = scmp.lt.u32.totalorder %s1364_s13, %s1598_s7 }
 0x29f   :  { %p1370_p11 = pnand %p1368_p10, %p1365_p9 }
 0x2a1   :  { %1373 = shalt.err (!%p1370_p11)
}
 0x2a2   :  { %964 = dma.vmem_to_hbm [thread:$0]  %s962_s9, 128, %s1598_s7, [#allocation4]   ;;  %v1044_v9 = vld [vmem:[%s1597_s6] ss:$0 sm:$0xff] }
 0x2a3   :  { %s1415_s24 = smov [#allocation11]  }
 0x2a4   :  { %s971_s25 = sshll.u32 %s1415_s24, 4  ;;  %s972_s25 = int_to_ptr.vmem [resolvable:$true] %s971_s25 }
 0x2a5   :  { %s1374_s26 = scalar_lea.vmem %s972_s25, 128  ;;  %p1379_p13 = scmp.lt.s32.totalorder %s972_s25, %s972_s25 }
 0x2a6   :  { %p1375_p12 = scmp.ne.s32.totalorder %s972_s25, %s1374_s26  ;;  %p1380_p0 = scmp.lt.s32.totalorder %s1374_s26, %s1374_s26 }
 0x2a8   :  { %p1381_p1 = por %p1380_p0, %p1379_p13 }
 0x2aa   :  { %p1382_p2 = pnand %p1381_p1, %p1375_p12 }
 0x36d   :  { %v948_v49 = vpop.f32.mrb[8].mxu0 }
 0x36e   :  { %v949_v50 = vadd.f32 %v1044_v9, %v948_v49  ;;  %v1183_v51 = vpop.f32.mrb[9].mxu0 }
 0x36f   :  { %v951_v52 = vpop.f32.mrb[10].mxu0 }
 0x370   :  { %954 = vst [vmem:[#allocation11] sm:$0xff] %v949_v50  ;;  %v1184_v53 = vpop.f32.mrb[11].mxu0 }
 0x371   :  { %1385 = shalt.err (!%p1382_p2)
}
 0x372   :  { %s1386_s6 = scalar_lea.hbm %s1599_s8, 128 }
 0x373   :  { %p1387_p3 = scmp.ne.s32.totalorder %s1599_s8, %s1386_s6  ;;  %p1390_p4 = scmp.lt.u32.totalorder %s1386_s6, %s1599_s8 }
 0x375   :  { %p1392_p5 = pnand %p1390_p4, %p1387_p3 }
 0x377   :  { %1395 = shalt.err (!%p1392_p5)
}
 0x378   :  { %974 = dma.vmem_to_hbm [thread:$0]  %s972_s25, 128, %s1599_s8, [#allocation12]  }
 0x379   :  { %1402 = dma.done.wait [#allocation4], 128  }
 0x37a   :  { %1403 = vsyncadd [#allocation4], 4294967168 }
 0x37b   :  { %1404 = dma.done.wait [#allocation12], 128  }
 0x37c   :  { %1405 = vsyncadd [#allocation12], 4294967168 }
 0x37d   :  { %981 = vsyncpa [#allocation3], 1 }
 0x37e   :  { %982 = vsyncpa [#allocation6], 1 }
 0x37f   :  { %983 = vsyncpa [#allocation9], 1 }
 0x380   :  { %984 = vsyncpa [#allocation4], 1 }
 0x381   :  { %985 = vsyncpa [#allocation12], 1 }

</bundles_post_ra>
